<compile_context>
chip_gen: v5e
topology: v5e:2x2
jax: 0.10.0
libtpu: 0.0.40
codegen_flags: <defaults>
</compile_context>

<pallas_src>
import jax
import jax.numpy as jnp
from jax.experimental import pallas as pl
from jax.experimental.pallas import tpu as pltpu


def _round_up(x, m):
    return ((x + m - 1) // m) * m


def diag_gaussian_kernel(x_ref, wt_ref, b_ref, mean_ref):
    # x_ref:    (TB, K)  current batch tile of inputs (pipelined by Pallas)
    # wt_ref:   (K, N)   fc_mean.weight^T, whole array, VMEM-resident
    # b_ref:    (1, N)   fc_mean.bias row (f32), whole array, VMEM-resident
    # mean_ref: (TB, N)  output tile in natural (B, N) layout -> no wrapper .T
    #
    # x @ W^T contracts x's last dim against wt's first dim: the natural MXU
    # operand layout, so no in-kernel transpose (XLU) is required.
    acc = jnp.dot(x_ref[...], wt_ref[...], preferred_element_type=jnp.float32)
    mean_ref[...] = (acc + b_ref[...]).astype(mean_ref.dtype)


def _choose_batch_tile(B, block_b):
    """Pick the batch tile size tb and grid length.

    Rules (review items 2, 4, 6):
      * single-step grid -> tb == B (full-extent BlockSpec rule, no padding)
      * multi-step grid  -> tb is a multiple of 128 (lane/sublane divisibility,
        works for f32 and bf16), ragged last tile is masked by Pallas
      * large B that fits one tile is still split into >=2 tiles so the v7x
        2-TensorCore "parallel" split has work for both cores
    """
    if B <= block_b:
        if B >= 1024:
            tb = _round_up(pl.cdiv(B, 2), 128)   # >= 2 steps, 128-multiple
        else:
            tb = B                               # single full-extent block
    else:
        tb = max((block_b // 128) * 128, 128)    # enforce tb % 128 == 0
    return tb, pl.cdiv(B, tb)


def diag_gaussian_forward(x, w, b, logstd, *, block_b=4096):
    """DiagGaussian.forward: returns (action_mean (B, N), scale (1, N)).

    FixedNormal(mean, scale) broadcasts the (1, N) scale over the batch, so the
    batch-constant scale is never materialized as (B, N).
    """
    B, K = x.shape
    N = w.shape[0]

    wt = w.T.astype(x.dtype)                      # (K, N), transposed once (tiny)
    b_row = b.reshape(1, N).astype(jnp.float32)   # bias row, f32 epilogue add

    tb, steps = _choose_batch_tile(B, block_b)
    grid = (steps,)

    mean = pl.pallas_call(
        diag_gaussian_kernel,
        out_shape=jax.ShapeDtypeStruct((B, N), x.dtype),
        grid_spec=pltpu.PrefetchScalarGridSpec(
            num_scalar_prefetch=0,
            grid=grid,
            in_specs=[
                # x tiled over batch; Pallas double-buffers HBM<->VMEM.
                pl.BlockSpec((tb, K), lambda i: (i, 0)),
                # Tiny params stay whole + resident in VMEM for the whole grid.
                pl.BlockSpec(memory_space=pltpu.MemorySpace.VMEM),  # W^T (K, N)
                pl.BlockSpec(memory_space=pltpu.MemorySpace.VMEM),  # b   (1, N)
            ],
            out_specs=pl.BlockSpec((tb, N), lambda i: (i, 0)),
        ),
        compiler_params=pltpu.CompilerParams(
            # Batch tiles are independent -> v7x's two TensorCores share them.
            dimension_semantics=("parallel",),
            # block_b=4096 keeps double-buffered x + out tiles at ~8 MiB:
            # under v5e's 16 MiB scoped-VMEM default (and v6e/v7x's 32 MiB),
            # so no explicit vmem_limit_bytes is required.
        ),
    )(x, wt, b_row)

    scale = jnp.exp(logstd)   # (1, N); FixedNormal broadcasts over the batch
    # TODO(synk): FixedNormal's sample/log_probs/entropy/clamped_sample are
    # distribution methods, not part of this forward kernel; only the
    # distribution parameters (mean, scale) are produced here.
    return mean, scale


def init_diag_gaussian_params(key, num_inputs, num_outputs, gain=0.01):
    """Matches DiagGaussian.__init__: orthogonal(gain=0.01) for fc_mean.weight,
    zeros for fc_mean.bias, zeros for the logstd AddBias parameter."""
    w = jax.nn.initializers.orthogonal(scale=gain)(
        key, (num_outputs, num_inputs), jnp.float32
    )                                                   # PyTorch (out, in)
    b = jnp.zeros((num_outputs,), jnp.float32)          # fc_mean.bias
    logstd = jnp.zeros((1, num_outputs), jnp.float32)   # AddBias parameter
    return w, b, logstd


if __name__ == "__main__":
    key = jax.random.PRNGKey(0)
    k_x, k_w = jax.random.split(key)

    batch, num_inputs, num_outputs = 16, 32, 8
    x = jax.random.normal(k_x, (batch, num_inputs), jnp.float32)
    w, b, logstd = init_diag_gaussian_params(k_w, num_inputs, num_outputs, gain=0.01)

    mean, scale = diag_gaussian_forward(x, w, b, logstd)
    jax.block_until_ready((mean, scale))

    # Reference in plain JAX (PyTorch Linear: x @ W.T + b).
    mean_ref = x @ w.T + b[None, :]
    scale_ref = jnp.exp(logstd)
    assert mean.shape == (batch, num_outputs)
    assert scale.shape == (1, num_outputs)
    assert jnp.allclose(mean, mean_ref, atol=1e-5), "mean mismatch"
    assert jnp.allclose(scale, scale_ref, atol=1e-6), "scale mismatch"

    # Multi-step tiled path with a ragged last tile (B not a multiple of tb).
    big_b = 1101
    xb = jax.random.normal(k_x, (big_b, num_inputs), jnp.float32)
    ref_b = xb @ w.T + b[None, :]
    mean_b, _ = diag_gaussian_forward(xb, w, b, logstd, block_b=256)
    jax.block_until_ready(mean_b)
    assert jnp.allclose(mean_b, ref_b, atol=1e-4), "tiled mean mismatch"

    # Default big-tile path: B >= 1024 splits into >=2 tiles (v7x 2-TC split).
    mean_c, _ = diag_gaussian_forward(xb, w, b, logstd)
    jax.block_until_ready(mean_c)
    assert jnp.allclose(mean_c, ref_b, atol=1e-4), "split-tile mean mismatch"

    # bf16 activations: f32 MXU accumulate, bf16 mean output.
    mean_bf, _ = diag_gaussian_forward(xb.astype(jnp.bfloat16), w, b, logstd)
    jax.block_until_ready(mean_bf)
    assert mean_bf.dtype == jnp.bfloat16
    assert jnp.allclose(mean_bf.astype(jnp.float32), ref_b, atol=1e-2, rtol=2e-2), \
        "bf16 mean mismatch"

    print("KERNEL_OK")
</pallas_src>

<mosaic_0001>
module attributes {stable_mosaic.version = 11 : i64} {
  func.func @diag_gaussian_kernel(%arg0: i32, %arg1: memref<16x32xf32, #tpu.memory_space<vmem>>, %arg2: memref<32x8xf32, #tpu.memory_space<vmem>>, %arg3: memref<1x8xf32, #tpu.memory_space<vmem>>, %arg4: memref<16x8xf32, #tpu.memory_space<vmem>>) attributes {dimension_semantics = [#tpu.dimension_semantics<parallel>], iteration_bounds = array<i64: 1>, scalar_prefetch = 0 : i64, scratch_operands = 0 : i64, tpu.core_type = #tpu.core_type<tc>, window_params = [{transform_indices = @transform_0, window_bounds = array<i64: 16, 32>}, {pipeline_mode = #tpu.pipeline_mode<synchronous>, transform_indices = @transform_1, window_bounds = array<i64: 32, 8>}, {pipeline_mode = #tpu.pipeline_mode<synchronous>, transform_indices = @transform_2, window_bounds = array<i64: 1, 8>}, {transform_indices = @transform_3, window_bounds = array<i64: 16, 8>}]} {
    %c0 = arith.constant 0 : index
    %c0_0 = arith.constant 0 : index
    %0 = vector.load %arg1[%c0, %c0_0] : memref<16x32xf32, #tpu.memory_space<vmem>>, vector<16x32xf32>
    %c0_1 = arith.constant 0 : index
    %c0_2 = arith.constant 0 : index
    %1 = vector.load %arg2[%c0_1, %c0_2] : memref<32x8xf32, #tpu.memory_space<vmem>>, vector<32x8xf32>
    %cst = arith.constant dense<0.000000e+00> : vector<16x8xf32>
    %2 = tpu.matmul %0, %1, %cst {dimension_numbers = #tpu.dot_dimension_numbers<[1], [0], [0], [1], [0, 0, 1, 1], [], []>} : vector<16x32xf32>, vector<32x8xf32>, vector<16x8xf32> -> vector<16x8xf32>
    %c0_3 = arith.constant 0 : index
    %c0_4 = arith.constant 0 : index
    %3 = vector.load %arg3[%c0_3, %c0_4] : memref<1x8xf32, #tpu.memory_space<vmem>>, vector<1x8xf32>
    %4 = vector.broadcast %3 : vector<1x8xf32> to vector<16x8xf32>
    %5 = arith.addf %2, %4 : vector<16x8xf32>
    %c0_5 = arith.constant 0 : index
    %c0_6 = arith.constant 0 : index
    %6 = vector.load %arg4[%c0_5, %c0_6] : memref<16x8xf32, #tpu.memory_space<vmem>>, vector<16x8xf32>
    tpu.vector_store %arg4[%c0_5, %c0_6], %5 {strides = array<i32>} : memref<16x8xf32, #tpu.memory_space<vmem>>, vector<16x8xf32>,
    return
  }
  func.func @transform_0(%arg0: i32) -> (i32, i32) {
    %c0_i32 = arith.constant 0 : i32
    %c0_i32_0 = arith.constant 0 : i32
    return %arg0, %c0_i32 : i32, i32
  }
  func.func @transform_1(%arg0: i32) -> (i32, i32) {
    %c0_i32 = arith.constant 0 : i32
    %c0_i32_0 = arith.constant 0 : i32
    %c0_i32_1 = arith.constant 0 : i32
    return %c0_i32, %c0_i32_0 : i32, i32
  }
  func.func @transform_2(%arg0: i32) -> (i32, i32) {
    %c0_i32 = arith.constant 0 : i32
    %c0_i32_0 = arith.constant 0 : i32
    %c0_i32_1 = arith.constant 0 : i32
    return %c0_i32, %c0_i32_0 : i32, i32
  }
  func.func @transform_3(%arg0: i32) -> (i32, i32) {
    %c0_i32 = arith.constant 0 : i32
    %c0_i32_0 = arith.constant 0 : i32
    return %arg0, %c0_i32 : i32, i32
  }
}

</mosaic_0001>

<bundles_post_ra>
// kernel: tpu_custom_call.1
= control target key start
LH: loop header
LB: loop body
LE: loop exit
PB: predicated region body
PF: predicated region fallthrough
CT: control target
= control target key end

     0   :  { %vm24_vm0 = vcmask 261120   ;;  %vm54_vm1 = vcmask 64512   ;;  %s115_s1 = inlined_call_operand.vmem [shape: f32[32,8], index: 1, kind: input, shape index: {}]   ;;  %s116_s2 = inlined_call_operand.vmem [shape: f32[1,8], index: 2, kind: input, shape index: {}]   ;;  %s117_s0 = inlined_call_operand.vmem [shape: f32[16,32], index: 0, kind: input, shape index: {}]   ;;  %s118_s3 = inlined_call_operand.vmem [shape: f32[16,8], index: 3, kind: output, shape index: {}]  }
   0x1   :  { %v19_v0 = vld [vmem:[%s115_s1 + $0x18] sm:$0xff]  ;;  %v18_v1 = vld [vmem:[%s115_s1 + $0x10] sm:$0xff]  ;;  %v17_v2 = vld [vmem:[%s115_s1 + $0x8] sm:$0xff] }
   0x2   :  { %43 = vmatpush.msra.mxu0 %v19_v0  ;;  %63 = vmatpush.msra.mxu1 %v19_v0  ;;  %v16_v3 = vld [vmem:[%s115_s1] sm:$0xff]  ;;  %v15_v5 = vld [vmem:[%s117_s0 + $0x8] sm:$0xff] }
   0x3   :  { %v14_v4 = vld [vmem:[%s117_s0] sm:$0xff] }
   0x4   :  { %44 = vmatpush.msra.mxu0 %v18_v1  ;;  %64 = vmatpush.msra.mxu1 %v18_v1  ;;  %v67_v6 = vld [vmem:[%s116_s2] ss:$0 sm:$0xff] }
   0x6   :  { %45 = vmatpush.msra.mxu0 %v17_v2  ;;  %65 = vmatpush.msra.mxu1 %v17_v2 }
   0x8   :  { %46 = vmatpush.msra.mxu0 %v16_v3  ;;  %66 = vmatpush.msra.mxu1 %v16_v3 }
   0x9   :  { %61 = vmatmul.msk.f32.vlgmr.msra.gmra.mxu0 %vm24_vm0, %v14_v4  ;;  %62 = vmatmul.msk.f32.vlgmr.msra.gmra.mxu1 %vm24_vm0, %v15_v5 }
  0x86   :  { %v48_v7 = vpop.f32.mrf.mxu0  ;;  %v51_v8 = vpop.f32.mrf.mxu1 }
  0x87   :  { %v49_v9 = vadd.f32 %v67_v6, %v48_v7  ;;  %v52_v10 = vadd.f32 %v67_v6, %v51_v8 }
  0x89   :  { %55 = vst.msk [vmem:[%s118_s3] sm:$0xff] %vm54_vm1, %v49_v9 }
  0x8a   :  { %56 = vst.msk [vmem:[%s118_s3 + $0x8] sm:$0xff] %vm54_vm1, %v52_v10 }

</bundles_post_ra>
